<compile_context>
chip_gen: v6e
topology: v6e:2x2x1
jax: 0.10.0
libtpu: 0.0.40
codegen_flags: <defaults>
</compile_context>

<pallas_src>
import functools

import jax
import jax.numpy as jnp
import numpy as np
from jax import lax
from jax.experimental import pallas as pl
from jax.experimental.pallas import tpu as pltpu


def _ca_block_kernel(lx_ref, hx_ref, wq_ref, wkv_ref, wo_ref, bo_ref,
                     out_ref, kv_ref, ho_ref, *, num_heads, head_dim, hidden):
    H, d = hidden, head_dim

    # --- K/V for the whole batch: once per batch (l == 0 runs first within a
    # batch because the l axis is "arbitrary" and hx's block depends only on b).
    @pl.when(pl.program_id(1) == 0)
    def _project_kv():
        kv = jnp.dot(hx_ref[0], wkv_ref[...],
                     preferred_element_type=jnp.float32)        # (Sh, 2H) f32
        kv_ref[...] = kv.astype(jnp.bfloat16)

    # --- Q for this l tile: one full-width matmul across all heads.
    q = jnp.dot(lx_ref[0], wq_ref[...],
                preferred_element_type=jnp.float32)             # (Tl, H) f32

    # --- per-head attention; unrolled so all slices are static.
    for h in range(num_heads):
        lo = h * d
        q_h = q[:, lo:lo + d]                                   # (Tl, d) f32
        k_h = kv_ref[:, lo:lo + d]                              # (Sh, d) bf16 (pre-scaled)
        v_h = kv_ref[:, H + lo:H + lo + d]                      # (Sh, d) bf16

        # 'qd,kd->qk' — contract on d for both operands, no K transpose.
        s = lax.dot_general(q_h.astype(jnp.bfloat16), k_h,
                            (((1,), (1,)), ((), ())),
                            preferred_element_type=jnp.float32)  # (Tl, Sh) f32
        s = s - jnp.max(s, axis=-1, keepdims=True)
        p = jnp.exp(s)
        p = p * pl.reciprocal(jnp.sum(p, axis=-1, keepdims=True), approx=True)

        ctx = jnp.dot(p.astype(jnp.bfloat16), v_h,
                      preferred_element_type=jnp.float32)        # (Tl, d) f32
        # Residual uses the UNSCALED q (scale was folded into K, not Q).
        ho_ref[:, lo:lo + d] = (q_h + ctx).astype(jnp.bfloat16)

    # --- single full-width out-projection + bias for the whole tile.
    out = jnp.dot(ho_ref[...], wo_ref[...], preferred_element_type=jnp.float32)
    out_ref[0] = (out + bo_ref[...]).astype(out_ref.dtype)
    # TODO(synk): save_attn side-effect (self.att_mat) is host-side state; not returned.


def _vmem_cap_bytes():
    """Per-core VMEM capacity; conservative (v7x) default if undetectable."""
    try:
        info = pltpu.get_tpu_info()
        cap = getattr(info, "vmem_capacity_bytes", None)
        if cap:
            return int(cap)
    except Exception:
        pass
    return 64 * 1024 * 1024


def _vmem_estimate(tile_l, sh, hidden, out_itemsize):
    weights = 4 * hidden * hidden * 2 + hidden * 4          # wq+wkv+wo bf16 (Buffered(1)) + f32 bias
    lx_blk = 2 * tile_l * hidden * 2                         # bf16 lx tile, double-buffered
    hx_blk = 2 * sh * hidden * 2                             # bf16 hx block, double-buffered
    out_blk = 2 * tile_l * hidden * out_itemsize
    scratch = sh * 2 * hidden * 2 + tile_l * hidden * 2      # [K|V] slab + head-output slab
    temps = tile_l * sh * 6 + sh * 2 * hidden * 4 + tile_l * hidden * 8
    return weights + lx_blk + hx_blk + out_blk + scratch + temps


def _pick_l_tile(sl, sh, hidden, out_itemsize, cap):
    budget = int(cap * 0.7)
    fallback = None
    for cand in (512, 256, 128, 64, 32, 16, 8):
        if cand <= sl and sl % cand == 0:
            if fallback is None:
                fallback = cand
            if _vmem_estimate(cand, sh, hidden, out_itemsize) <= budget:
                return cand
    return fallback if fallback is not None else sl


def ca_block(lx, hx, w_qkv, w_out, b_out, num_heads):
    """lx: (B, Sl, H) queries, hx: (B, Sh, H) keys/values.
    w_qkv: (3H, H) torch Linear weight (no bias), w_out: (H, H), b_out: (H,)."""
    B, Sl, H = lx.shape
    Bh, Sh, Hh = hx.shape
    if Hh != H or Bh != B:
        raise ValueError("lx and hx must share batch and hidden size.")
    if H % num_heads != 0:
        raise ValueError("hidden size should be divisible by num_heads.")
    d = H // num_heads
    scale = float(d) ** -0.5

    # --- weight prep (plain JAX glue; torch Linear computes x @ W.T). The qkv
    # output features are ordered (qkv, head, dim) per the '(qkv l d)' einops
    # split, so the transposed weight columns are already head-major.
    wq = w_qkv[0 * H:1 * H].T.astype(jnp.bfloat16)                 # (H, H)
    wk = (w_qkv[1 * H:2 * H].T * scale).astype(jnp.bfloat16)       # scale folded into K only
    wv = w_qkv[2 * H:3 * H].T.astype(jnp.bfloat16)
    wkv = jnp.concatenate([wk, wv], axis=1)                        # (H, 2H) = [K*scale | V]
    wo = w_out.T.astype(jnp.bfloat16)                              # (H, H)
    bo = b_out.reshape(1, H).astype(jnp.float32)

    # bf16 activations at the kernel boundary: removes duplicate VMEM copies
    # and in-kernel casts, and halves activation DMA bytes.
    lx_b = lx.astype(jnp.bfloat16)
    hx_b = hx.astype(jnp.bfloat16)

    out_dtype = lx.dtype
    out_itemsize = jnp.dtype(out_dtype).itemsize
    cap = _vmem_cap_bytes()
    tile_l = _pick_l_tile(Sl, Sh, H, out_itemsize, cap)
    n_l = Sl // tile_l
    # TODO(synk): with B == 1 on a dual-TensorCore chip (v7x) this runs on one
    # core: the l axis must stay "arbitrary" for the per-batch K/V cache.

    vmem_limit = min(
        max(int(_vmem_estimate(tile_l, Sh, H, out_itemsize) * 1.5), 32 * 1024 * 1024),
        int(cap * 0.75))

    flops = (2 * B * Sl * H * H            # Q projection
             + 2 * B * Sh * H * 2 * H      # K/V projection
             + 2 * B * Sl * Sh * H * 2     # scores + context over all heads
             + 2 * B * Sl * H * H)         # out projection
    bytes_accessed = (lx_b.size * 2 + hx_b.size * 2 + B * Sl * H * out_itemsize
                      + 4 * H * H * 2 + H * 4)
    cost = pl.CostEstimate(flops=int(flops),
                           transcendentals=int(B * num_heads * Sl * Sh),
                           bytes_accessed=int(bytes_accessed))

    kernel = functools.partial(_ca_block_kernel, num_heads=num_heads,
                               head_dim=d, hidden=H)
    const2 = lambda b, l: (0, 0)

    return pl.pallas_call(
        kernel,
        out_shape=jax.ShapeDtypeStruct((B, Sl, H), out_dtype),
        grid=(B, n_l),
        in_specs=[
            pl.BlockSpec((1, tile_l, H), lambda b, l: (b, l, 0)),            # lx tile (bf16)
            pl.BlockSpec((1, Sh, H), lambda b, l: (b, 0, 0)),                # hx, full seq (bf16)
            pl.BlockSpec((H, H), const2, pipeline_mode=pl.Buffered(1)),      # Wq
            pl.BlockSpec((H, 2 * H), const2, pipeline_mode=pl.Buffered(1)),  # [Wk*scale | Wv]
            pl.BlockSpec((H, H), const2, pipeline_mode=pl.Buffered(1)),      # Wo
            pl.BlockSpec((1, H), const2, pipeline_mode=pl.Buffered(1)),      # out bias
        ],
        out_specs=pl.BlockSpec((1, tile_l, H), lambda b, l: (b, l, 0)),
        scratch_shapes=[
            pltpu.VMEM((Sh, 2 * H), jnp.bfloat16),    # per-batch [K|V] cache
            pltpu.VMEM((tile_l, H), jnp.bfloat16),    # per-tile head-output slab
        ],
        compiler_params=pltpu.CompilerParams(
            dimension_semantics=("parallel", "arbitrary"),
            vmem_limit_bytes=vmem_limit,
        ),
        cost_estimate=cost,
    )(lx_b, hx_b, wq, wkv, wo, bo)


def ca_block_reference(lx, hx, w_qkv, w_out, b_out, num_heads):
    """Pure-JAX (f32) reference mirroring the PyTorch forward."""
    B, Sl, H = lx.shape
    d = H // num_heads

    def proj(x):
        y = x @ w_qkv.T                                  # (B, S, 3H)
        y = y.reshape(B, x.shape[1], 3, num_heads, d)    # 'b s (qkv l d)'
        return jnp.transpose(y, (2, 0, 3, 1, 4))         # (3, B, nH, S, d)

    q = proj(lx)[0]
    hproj = proj(hx)
    k, v = hproj[1], hproj[2]
    att = jax.nn.softmax(
        jnp.einsum('bhxd,bhyd->bhxy', q, k) * (d ** -0.5), axis=-1)
    o = q + jnp.einsum('bhxy,bhyd->bhxd', att, v)        # (B, nH, Sl, d)
    o = jnp.transpose(o, (0, 2, 1, 3)).reshape(B, Sl, H) # 'b h l d -> b l (h d)'
    return o @ w_out.T + b_out


if __name__ == "__main__":
    B, Sl, Sh, H, num_heads = 2, 8, 16, 32, 4

    key = jax.random.PRNGKey(0)
    k1, k2, k3, k4, k5 = jax.random.split(key, 5)
    lx = jax.random.normal(k1, (B, Sl, H), jnp.float32)
    hx = jax.random.normal(k2, (B, Sh, H), jnp.float32)
    w_qkv = jax.random.normal(k3, (3 * H, H), jnp.float32) * 0.05
    w_out = jax.random.normal(k4, (H, H), jnp.float32) * 0.05
    b_out = jax.random.normal(k5, (H,), jnp.float32) * 0.05

    out = jax.block_until_ready(ca_block(lx, hx, w_qkv, w_out, b_out, num_heads))

    ref = ca_block_reference(lx, hx, w_qkv, w_out, b_out, num_heads)
    # bf16 matmul operands + EUP approx reciprocal -> looser tolerance than f32.
    np.testing.assert_allclose(np.asarray(out), np.asarray(ref), rtol=2e-2, atol=2e-2)

    print("KERNEL_OK")
</pallas_src>

<mosaic_0001>
module attributes {stable_mosaic.version = 11 : i64} {
  func.func @_ca_block_kernel(%arg0: i32, %arg1: i32, %arg2: memref<1x8x32xbf16, #tpu.memory_space<vmem>>, %arg3: memref<1x16x32xbf16, #tpu.memory_space<vmem>>, %arg4: memref<32x32xbf16, #tpu.memory_space<vmem>>, %arg5: memref<32x64xbf16, #tpu.memory_space<vmem>>, %arg6: memref<32x32xbf16, #tpu.memory_space<vmem>>, %arg7: memref<1x32xf32, #tpu.memory_space<vmem>>, %arg8: memref<1x8x32xf32, #tpu.memory_space<vmem>>, %arg9: memref<16x64xbf16, #tpu.memory_space<vmem>>, %arg10: memref<8x32xbf16, #tpu.memory_space<vmem>>) attributes {dimension_semantics = [#tpu.dimension_semantics<parallel>, #tpu.dimension_semantics<arbitrary>], iteration_bounds = array<i64: 2, 1>, scalar_prefetch = 0 : i64, scratch_operands = 2 : i64, tpu.core_type = #tpu.core_type<tc>, window_params = [{transform_indices = @transform_0, window_bounds = array<i64: 1, 8, 32>}, {transform_indices = @transform_1, window_bounds = array<i64: 1, 16, 32>}, {pipeline_mode = #tpu.pipeline_mode<synchronous>, transform_indices = @transform_2, window_bounds = array<i64: 32, 32>}, {pipeline_mode = #tpu.pipeline_mode<synchronous>, transform_indices = @transform_3, window_bounds = array<i64: 32, 64>}, {pipeline_mode = #tpu.pipeline_mode<synchronous>, transform_indices = @transform_4, window_bounds = array<i64: 32, 32>}, {pipeline_mode = #tpu.pipeline_mode<synchronous>, transform_indices = @transform_5, window_bounds = array<i64: 1, 32>}, {transform_indices = @transform_6, window_bounds = array<i64: 1, 8, 32>}]} {
    %c0_i32 = arith.constant 0 : i32
    %0 = arith.cmpi eq, %arg1, %c0_i32 : i32
    %1 = arith.extui %0 : i1 to i32
    %c0_i32_0 = arith.constant 0 : i32
    %2 = arith.cmpi ne, %1, %c0_i32_0 : i32
    scf.if %2 {
      %c0_48 = arith.constant 0 : index
      %c0_49 = arith.constant 0 : index
      %c0_50 = arith.constant 0 : index
      %96 = vector.load %arg3[%c0_48, %c0_49, %c0_50] : memref<1x16x32xbf16, #tpu.memory_space<vmem>>, vector<1x16x32xbf16>
      %97 = vector.shape_cast %96 : vector<1x16x32xbf16> to vector<16x32xbf16>
      %c0_51 = arith.constant 0 : index
      %c0_52 = arith.constant 0 : index
      %98 = vector.load %arg5[%c0_51, %c0_52] : memref<32x64xbf16, #tpu.memory_space<vmem>>, vector<32x64xbf16>
      %cst_53 = arith.constant dense<0.000000e+00> : vector<16x64xf32>
      %99 = tpu.matmul %97, %98, %cst_53 {dimension_numbers = #tpu.dot_dimension_numbers<[1], [0], [0], [1], [0, 0, 1, 1], [], []>} : vector<16x32xbf16>, vector<32x64xbf16>, vector<16x64xf32> -> vector<16x64xf32>
      %100 = arith.truncf %99 : vector<16x64xf32> to vector<16x64xbf16>
      %c0_54 = arith.constant 0 : index
      %c0_55 = arith.constant 0 : index
      %101 = vector.load %arg9[%c0_54, %c0_55] : memref<16x64xbf16, #tpu.memory_space<vmem>>, vector<16x64xbf16>
      tpu.vector_store %arg9[%c0_54, %c0_55], %100 {strides = array<i32>} : memref<16x64xbf16, #tpu.memory_space<vmem>>, vector<16x64xbf16>,
    } else {
    }
    %c0 = arith.constant 0 : index
    %c0_1 = arith.constant 0 : index
    %c0_2 = arith.constant 0 : index
    %3 = vector.load %arg2[%c0, %c0_1, %c0_2] : memref<1x8x32xbf16, #tpu.memory_space<vmem>>, vector<1x8x32xbf16>
    %4 = vector.shape_cast %3 : vector<1x8x32xbf16> to vector<8x32xbf16>
    %c0_3 = arith.constant 0 : index
    %c0_4 = arith.constant 0 : index
    %5 = vector.load %arg4[%c0_3, %c0_4] : memref<32x32xbf16, #tpu.memory_space<vmem>>, vector<32x32xbf16>
    %cst = arith.constant dense<0.000000e+00> : vector<8x32xf32>
    %6 = tpu.matmul %4, %5, %cst {dimension_numbers = #tpu.dot_dimension_numbers<[1], [0], [0], [1], [0, 0, 1, 1], [], []>} : vector<8x32xbf16>, vector<32x32xbf16>, vector<8x32xf32> -> vector<8x32xf32>
    %7 = vector.extract_strided_slice %6 {offsets = [0, 0], sizes = [8, 8], strides = [1, 1]} : vector<8x32xf32> to vector<8x8xf32>
    %c0_5 = arith.constant 0 : index
    %c0_6 = arith.constant 0 : index
    %8 = vector.load %arg9[%c0_5, %c0_6] : memref<16x64xbf16, #tpu.memory_space<vmem>>, vector<16x8xbf16>
    %c0_7 = arith.constant 0 : index
    %c32 = arith.constant 32 : index
    %9 = vector.load %arg9[%c0_7, %c32] : memref<16x64xbf16, #tpu.memory_space<vmem>>, vector<16x8xbf16>
    %10 = arith.truncf %7 : vector<8x8xf32> to vector<8x8xbf16>
    %cst_8 = arith.constant dense<0.000000e+00> : vector<8x16xf32>
    %11 = tpu.matmul %10, %8, %cst_8 {dimension_numbers = #tpu.dot_dimension_numbers<[1], [1], [0], [0], [0, 0, 1, 0], [], []>} : vector<8x8xbf16>, vector<16x8xbf16>, vector<8x16xf32> -> vector<8x16xf32>
    %cst_9 = arith.constant dense<0xFF800000> : vector<8xf32>
    %12 = vector.multi_reduction <maximumf>, %11, %cst_9 [1] : vector<8x16xf32> to vector<8xf32>
    %13 = vector.shape_cast %12 : vector<8xf32> to vector<8x1xf32>
    %14 = vector.broadcast %13 : vector<8x1xf32> to vector<8x16xf32>
    %15 = arith.subf %11, %14 : vector<8x16xf32>
    %16 = math.exp %15 : vector<8x16xf32>
    %cst_10 = arith.constant dense<0.000000e+00> : vector<8xf32>
    %17 = vector.multi_reduction <add>, %16, %cst_10 [1] : vector<8x16xf32> to vector<8xf32>
    %18 = vector.shape_cast %17 : vector<8xf32> to vector<8x1xf32>
    %19 = tpu.reciprocal %18 {approx = true} : vector<8x1xf32> -> vector<8x1xf32>
    %20 = vector.broadcast %19 : vector<8x1xf32> to vector<8x16xf32>
    %21 = arith.mulf %16, %20 : vector<8x16xf32>
    %22 = arith.truncf %21 : vector<8x16xf32> to vector<8x16xbf16>
    %cst_11 = arith.constant dense<0.000000e+00> : vector<8x8xf32>
    %23 = tpu.matmul %22, %9, %cst_11 {dimension_numbers = #tpu.dot_dimension_numbers<[1], [0], [0], [1], [0, 0, 1, 1], [], []>} : vector<8x16xbf16>, vector<16x8xbf16>, vector<8x8xf32> -> vector<8x8xf32>
    %24 = arith.addf %7, %23 : vector<8x8xf32>
    %25 = arith.truncf %24 : vector<8x8xf32> to vector<8x8xbf16>
    %c0_12 = arith.constant 0 : index
    %c0_13 = arith.constant 0 : index
    %26 = vector.load %arg10[%c0_12, %c0_13] : memref<8x32xbf16, #tpu.memory_space<vmem>>, vector<8x8xbf16>
    tpu.vector_store %arg10[%c0_12, %c0_13], %25 {strides = array<i32>} : memref<8x32xbf16, #tpu.memory_space<vmem>>, vector<8x8xbf16>,
    %27 = vector.extract_strided_slice %6 {offsets = [0, 8], sizes = [8, 8], strides = [1, 1]} : vector<8x32xf32> to vector<8x8xf32>
    %c0_14 = arith.constant 0 : index
    %c8 = arith.constant 8 : index
    %28 = vector.load %arg9[%c0_14, %c8] : memref<16x64xbf16, #tpu.memory_space<vmem>>, vector<16x8xbf16>
    %c0_15 = arith.constant 0 : index
    %c40 = arith.constant 40 : index
    %29 = vector.load %arg9[%c0_15, %c40] : memref<16x64xbf16, #tpu.memory_space<vmem>>, vector<16x8xbf16>
    %30 = arith.truncf %27 : vector<8x8xf32> to vector<8x8xbf16>
    %cst_16 = arith.constant dense<0.000000e+00> : vector<8x16xf32>
    %31 = tpu.matmul %30, %28, %cst_16 {dimension_numbers = #tpu.dot_dimension_numbers<[1], [1], [0], [0], [0, 0, 1, 0], [], []>} : vector<8x8xbf16>, vector<16x8xbf16>, vector<8x16xf32> -> vector<8x16xf32>
    %cst_17 = arith.constant dense<0xFF800000> : vector<8xf32>
    %32 = vector.multi_reduction <maximumf>, %31, %cst_17 [1] : vector<8x16xf32> to vector<8xf32>
    %33 = vector.shape_cast %32 : vector<8xf32> to vector<8x1xf32>
    %34 = vector.broadcast %33 : vector<8x1xf32> to vector<8x16xf32>
    %35 = arith.subf %31, %34 : vector<8x16xf32>
    %36 = math.exp %35 : vector<8x16xf32>
    %cst_18 = arith.constant dense<0.000000e+00> : vector<8xf32>
    %37 = vector.multi_reduction <add>, %36, %cst_18 [1] : vector<8x16xf32> to vector<8xf32>
    %38 = vector.shape_cast %37 : vector<8xf32> to vector<8x1xf32>
    %39 = tpu.reciprocal %38 {approx = true} : vector<8x1xf32> -> vector<8x1xf32>
    %40 = vector.broadcast %39 : vector<8x1xf32> to vector<8x16xf32>
    %41 = arith.mulf %36, %40 : vector<8x16xf32>
    %42 = arith.truncf %41 : vector<8x16xf32> to vector<8x16xbf16>
    %cst_19 = arith.constant dense<0.000000e+00> : vector<8x8xf32>
    %43 = tpu.matmul %42, %29, %cst_19 {dimension_numbers = #tpu.dot_dimension_numbers<[1], [0], [0], [1], [0, 0, 1, 1], [], []>} : vector<8x16xbf16>, vector<16x8xbf16>, vector<8x8xf32> -> vector<8x8xf32>
    %44 = arith.addf %27, %43 : vector<8x8xf32>
    %45 = arith.truncf %44 : vector<8x8xf32> to vector<8x8xbf16>
    %c0_20 = arith.constant 0 : index
    %c8_21 = arith.constant 8 : index
    %46 = vector.load %arg10[%c0_20, %c8_21] : memref<8x32xbf16, #tpu.memory_space<vmem>>, vector<8x8xbf16>
    tpu.vector_store %arg10[%c0_20, %c8_21], %45 {strides = array<i32>} : memref<8x32xbf16, #tpu.memory_space<vmem>>, vector<8x8xbf16>,
    %47 = vector.extract_strided_slice %6 {offsets = [0, 16], sizes = [8, 8], strides = [1, 1]} : vector<8x32xf32> to vector<8x8xf32>
    %c0_22 = arith.constant 0 : index
    %c16 = arith.constant 16 : index
    %48 = vector.load %arg9[%c0_22, %c16] : memref<16x64xbf16, #tpu.memory_space<vmem>>, vector<16x8xbf16>
    %c0_23 = arith.constant 0 : index
    %c48 = arith.constant 48 : index
    %49 = vector.load %arg9[%c0_23, %c48] : memref<16x64xbf16, #tpu.memory_space<vmem>>, vector<16x8xbf16>
    %50 = arith.truncf %47 : vector<8x8xf32> to vector<8x8xbf16>
    %cst_24 = arith.constant dense<0.000000e+00> : vector<8x16xf32>
    %51 = tpu.matmul %50, %48, %cst_24 {dimension_numbers = #tpu.dot_dimension_numbers<[1], [1], [0], [0], [0, 0, 1, 0], [], []>} : vector<8x8xbf16>, vector<16x8xbf16>, vector<8x16xf32> -> vector<8x16xf32>
    %cst_25 = arith.constant dense<0xFF800000> : vector<8xf32>
    %52 = vector.multi_reduction <maximumf>, %51, %cst_25 [1] : vector<8x16xf32> to vector<8xf32>
    %53 = vector.shape_cast %52 : vector<8xf32> to vector<8x1xf32>
    %54 = vector.broadcast %53 : vector<8x1xf32> to vector<8x16xf32>
    %55 = arith.subf %51, %54 : vector<8x16xf32>
    %56 = math.exp %55 : vector<8x16xf32>
    %cst_26 = arith.constant dense<0.000000e+00> : vector<8xf32>
    %57 = vector.multi_reduction <add>, %56, %cst_26 [1] : vector<8x16xf32> to vector<8xf32>
    %58 = vector.shape_cast %57 : vector<8xf32> to vector<8x1xf32>
    %59 = tpu.reciprocal %58 {approx = true} : vector<8x1xf32> -> vector<8x1xf32>
    %60 = vector.broadcast %59 : vector<8x1xf32> to vector<8x16xf32>
    %61 = arith.mulf %56, %60 : vector<8x16xf32>
    %62 = arith.truncf %61 : vector<8x16xf32> to vector<8x16xbf16>
    %cst_27 = arith.constant dense<0.000000e+00> : vector<8x8xf32>
    %63 = tpu.matmul %62, %49, %cst_27 {dimension_numbers = #tpu.dot_dimension_numbers<[1], [0], [0], [1], [0, 0, 1, 1], [], []>} : vector<8x16xbf16>, vector<16x8xbf16>, vector<8x8xf32> -> vector<8x8xf32>
    %64 = arith.addf %47, %63 : vector<8x8xf32>
    %65 = arith.truncf %64 : vector<8x8xf32> to vector<8x8xbf16>
    %c0_28 = arith.constant 0 : index
    %c16_29 = arith.constant 16 : index
    %66 = vector.load %arg10[%c0_28, %c16_29] : memref<8x32xbf16, #tpu.memory_space<vmem>>, vector<8x8xbf16>
    tpu.vector_store %arg10[%c0_28, %c16_29], %65 {strides = array<i32>} : memref<8x32xbf16, #tpu.memory_space<vmem>>, vector<8x8xbf16>,
    %67 = vector.extract_strided_slice %6 {offsets = [0, 24], sizes = [8, 8], strides = [1, 1]} : vector<8x32xf32> to vector<8x8xf32>
    %c0_30 = arith.constant 0 : index
    %c24 = arith.constant 24 : index
    %68 = vector.load %arg9[%c0_30, %c24] : memref<16x64xbf16, #tpu.memory_space<vmem>>, vector<16x8xbf16>
    %c0_31 = arith.constant 0 : index
    %c56 = arith.constant 56 : index
    %69 = vector.load %arg9[%c0_31, %c56] : memref<16x64xbf16, #tpu.memory_space<vmem>>, vector<16x8xbf16>
    %70 = arith.truncf %67 : vector<8x8xf32> to vector<8x8xbf16>
    %cst_32 = arith.constant dense<0.000000e+00> : vector<8x16xf32>
    %71 = tpu.matmul %70, %68, %cst_32 {dimension_numbers = #tpu.dot_dimension_numbers<[1], [1], [0], [0], [0, 0, 1, 0], [], []>} : vector<8x8xbf16>, vector<16x8xbf16>, vector<8x16xf32> -> vector<8x16xf32>
    %cst_33 = arith.constant dense<0xFF800000> : vector<8xf32>
    %72 = vector.multi_reduction <maximumf>, %71, %cst_33 [1] : vector<8x16xf32> to vector<8xf32>
    %73 = vector.shape_cast %72 : vector<8xf32> to vector<8x1xf32>
    %74 = vector.broadcast %73 : vector<8x1xf32> to vector<8x16xf32>
    %75 = arith.subf %71, %74 : vector<8x16xf32>
    %76 = math.exp %75 : vector<8x16xf32>
    %cst_34 = arith.constant dense<0.000000e+00> : vector<8xf32>
    %77 = vector.multi_reduction <add>, %76, %cst_34 [1] : vector<8x16xf32> to vector<8xf32>
    %78 = vector.shape_cast %77 : vector<8xf32> to vector<8x1xf32>
    %79 = tpu.reciprocal %78 {approx = true} : vector<8x1xf32> -> vector<8x1xf32>
    %80 = vector.broadcast %79 : vector<8x1xf32> to vector<8x16xf32>
    %81 = arith.mulf %76, %80 : vector<8x16xf32>
    %82 = arith.truncf %81 : vector<8x16xf32> to vector<8x16xbf16>
    %cst_35 = arith.constant dense<0.000000e+00> : vector<8x8xf32>
    %83 = tpu.matmul %82, %69, %cst_35 {dimension_numbers = #tpu.dot_dimension_numbers<[1], [0], [0], [1], [0, 0, 1, 1], [], []>} : vector<8x16xbf16>, vector<16x8xbf16>, vector<8x8xf32> -> vector<8x8xf32>
    %84 = arith.addf %67, %83 : vector<8x8xf32>
    %85 = arith.truncf %84 : vector<8x8xf32> to vector<8x8xbf16>
    %c0_36 = arith.constant 0 : index
    %c24_37 = arith.constant 24 : index
    %86 = vector.load %arg10[%c0_36, %c24_37] : memref<8x32xbf16, #tpu.memory_space<vmem>>, vector<8x8xbf16>
    tpu.vector_store %arg10[%c0_36, %c24_37], %85 {strides = array<i32>} : memref<8x32xbf16, #tpu.memory_space<vmem>>, vector<8x8xbf16>,
    %c0_38 = arith.constant 0 : index
    %c0_39 = arith.constant 0 : index
    %87 = vector.load %arg10[%c0_38, %c0_39] : memref<8x32xbf16, #tpu.memory_space<vmem>>, vector<8x32xbf16>
    %c0_40 = arith.constant 0 : index
    %c0_41 = arith.constant 0 : index
    %88 = vector.load %arg6[%c0_40, %c0_41] : memref<32x32xbf16, #tpu.memory_space<vmem>>, vector<32x32xbf16>
    %cst_42 = arith.constant dense<0.000000e+00> : vector<8x32xf32>
    %89 = tpu.matmul %87, %88, %cst_42 {dimension_numbers = #tpu.dot_dimension_numbers<[1], [0], [0], [1], [0, 0, 1, 1], [], []>} : vector<8x32xbf16>, vector<32x32xbf16>, vector<8x32xf32> -> vector<8x32xf32>
    %c0_43 = arith.constant 0 : index
    %c0_44 = arith.constant 0 : index
    %90 = vector.load %arg7[%c0_43, %c0_44] : memref<1x32xf32, #tpu.memory_space<vmem>>, vector<1x32xf32>
    %91 = vector.broadcast %90 : vector<1x32xf32> to vector<8x32xf32>
    %92 = arith.addf %89, %91 : vector<8x32xf32>
    %c0_45 = arith.constant 0 : index
    %c0_46 = arith.constant 0 : index
    %c0_47 = arith.constant 0 : index
    %93 = vector.load %arg8[%c0_45, %c0_46, %c0_47] : memref<1x8x32xf32, #tpu.memory_space<vmem>>, vector<1x8x32xf32>
    %94 = vector.shape_cast %93 : vector<1x8x32xf32> to vector<8x32xf32>
    %95 = vector.shape_cast %92 : vector<8x32xf32> to vector<1x8x32xf32>
    tpu.vector_store %arg8[%c0_45, %c0_46, %c0_47], %95 {strides = array<i32>} : memref<1x8x32xf32, #tpu.memory_space<vmem>>, vector<1x8x32xf32>,
    return
  }
  func.func @transform_0(%arg0: i32, %arg1: i32) -> (i32, i32, i32) {
    %c0_i32 = arith.constant 0 : i32
    %c0_i32_0 = arith.constant 0 : i32
    return %arg0, %arg1, %c0_i32 : i32, i32, i32
  }
  func.func @transform_1(%arg0: i32, %arg1: i32) -> (i32, i32, i32) {
    %c0_i32 = arith.constant 0 : i32
    %c0_i32_0 = arith.constant 0 : i32
    %c0_i32_1 = arith.constant 0 : i32
    return %arg0, %c0_i32, %c0_i32_0 : i32, i32, i32
  }
  func.func @transform_2(%arg0: i32, %arg1: i32) -> (i32, i32) {
    %c0_i32 = arith.constant 0 : i32
    %c0_i32_0 = arith.constant 0 : i32
    %c0_i32_1 = arith.constant 0 : i32
    return %c0_i32, %c0_i32_0 : i32, i32
  }
  func.func @transform_3(%arg0: i32, %arg1: i32) -> (i32, i32) {
    %c0_i32 = arith.constant 0 : i32
    %c0_i32_0 = arith.constant 0 : i32
    %c0_i32_1 = arith.constant 0 : i32
    return %c0_i32, %c0_i32_0 : i32, i32
  }
  func.func @transform_4(%arg0: i32, %arg1: i32) -> (i32, i32) {
    %c0_i32 = arith.constant 0 : i32
    %c0_i32_0 = arith.constant 0 : i32
    %c0_i32_1 = arith.constant 0 : i32
    return %c0_i32, %c0_i32_0 : i32, i32
  }
  func.func @transform_5(%arg0: i32, %arg1: i32) -> (i32, i32) {
    %c0_i32 = arith.constant 0 : i32
    %c0_i32_0 = arith.constant 0 : i32
    %c0_i32_1 = arith.constant 0 : i32
    return %c0_i32, %c0_i32_0 : i32, i32
  }
  func.func @transform_6(%arg0: i32, %arg1: i32) -> (i32, i32, i32) {
    %c0_i32 = arith.constant 0 : i32
    %c0_i32_0 = arith.constant 0 : i32
    return %arg0, %arg1, %c0_i32 : i32, i32, i32
  }
}

</mosaic_0001>

<bundles_post_ra>
// kernel: tpu_custom_call.1
= control target key start
LH: loop header
LB: loop body
LE: loop exit
PB: predicated region body
PF: predicated region fallthrough
CT: control target
= control target key end

     0   :  { %s2108_s0 = inlined_call_operand.hbm [shape: bf16[2,8,32], index: 0, kind: input, shape index: {}]   ;;  %s2109_s1 = inlined_call_operand.hbm [shape: bf16[2,16,32], index: 1, kind: input, shape index: {}]   ;;  %s2110_s2 = inlined_call_operand.hbm [shape: bf16[32,32], index: 2, kind: input, shape index: {}]   ;;  %s2111_s3 = inlined_call_operand.hbm [shape: bf16[32,64], index: 3, kind: input, shape index: {}]   ;;  %s2112_s4 = inlined_call_operand.hbm [shape: bf16[32,32], index: 4, kind: input, shape index: {}]   ;;  %s2113_s5 = inlined_call_operand.vmem [shape: f32[1,32], index: 5, kind: input, shape index: {}]   ;;  %s2114_s6 = inlined_call_operand.hbm [shape: f32[2,8,32], index: 6, kind: output, shape index: {}]  }
   0x1   :  { %2120 = sst [smem:[#allocation21_spill]] %s2108_s0 }
   0x2   :  { %2121 = sst [smem:[#allocation22_spill]] %s2110_s2 }
   0x3   :  { %2122 = sst [smem:[#allocation23_spill]] %s2111_s3 }
   0x4   :  { %2123 = sst [smem:[#allocation24_spill]] %s2112_s4 }
   0x5   :  { %11 = vsyncpa [#allocation5], 0 }
   0x6   :  { %13 = vsyncpa [#allocation5 + $0x1], 0 }
   0x7   :  { %14 = vsyncpa [#allocation8], 0 }
   0x8   :  { %16 = vsyncpa [#allocation8 + $0x1], 0 }
   0x9   :  { %17 = vsyncpa [#allocation11], 0 }
   0xa   :  { %18 = vsyncpa [#allocation6], 0 }
   0xb   :  { %20 = vsyncpa [#allocation6 + $0x1], 0  ;;  %s1784_s21 = smov 0   ;;  %s1786_s22 = smov 0  }
   0xc   :  { %s1788_s23 = smov 0   ;;  %s1790_s24 = smov 0  }
   0xd   :  { %s1792_s25 = smov 0   ;;  %s1794_s26 = smov 0  }
   0xe LB: > { %2124 = sst [smem:[#allocation19_spill]] %s1723_s25  ;;  %s1815_s27 = sadd.s32 4294967295, %s1727_s26   ;;  %s1727_s26 = sphi %s1794_s26, %s26_s26   ;;  %s1723_s25 = sphi %s1792_s25, %s2144_s25   ;;  %s1719_s24 = sphi %s1790_s24, %s2143_s24   ;;  %s1715_s23 = sphi %s1788_s23, %s2147_s23   ;;  %s1711_s22 = sphi %s1786_s22, %s2146_s22   ;;  %s1707_s21 = sphi %s1784_s21, %s2145_s21  }
   0xf   : > { %s1215_s28 = sadd.s32 4294967294, %s1727_s26   ;;  %p60_p0 = scmp.ne.s32.totalorder %s1711_s22, %s1707_s21 }
  0x10   : > { %p2115_p1 = scmp.eq.s32.totalorder %s1815_s27, 0  ;;  %p196_p2 = scmp.eq.s32.totalorder %s1815_s27, 1 }
  0x11   : > { %p202_p3 = scmp.eq.s32.totalorder %s1215_s28, 1  ;;  %p1216_p5 = scmp.ge.s32.totalorder %s1727_s26, 1 }
  0x12   : > { %p1824_p4 = por %p2115_p1, %p60_p0  ;;  %p209_p7 = scmp.lt.s32.totalorder %s1727_s26, 3 }
  0x13   : > { %p1829_p6 = por %p202_p3, %p60_p0  ;;  %s1729_s8 = smov [#allocation9]  }
  0x14   : > { %p1834_p8 = pnand %p1216_p5, %p209_p7  ;;  %s221_s9 = sshll.u32 %s1729_s8, 4  ;;  %s222_s9 = int_to_ptr.vmem [resolvable:$true] %s221_s9 }
  0x15   : > { %s1730_s11 = smov [#allocation10]   ;;  %s1731_s13 = smov [#allocation12]  }
  0x16   : > { %p1380_p9 = pneg %p1834_p8  ;;  %s234_s12 = sshll.u32 %s1730_s11, 4  ;;  %s235_s12 = int_to_ptr.vmem [resolvable:$true] %s234_s12 }
  0x17   : > { %s247_s14 = sshll.u32 %s1731_s13, 4  ;;  %s1512_s15 = scalar_lea.vmem %s222_s9, 256  ;;  %s248_s14 = int_to_ptr.vmem [resolvable:$true] %s247_s14 }
  0x18   : > { %p1843_p11 = pnand %p1380_p9, %p2115_p1  ;;  %p1513_p13 = scmp.ne.s32.totalorder %s222_s9, %s1512_s15 }
  0x19   : > { %p1520_p5 = scmp.lt.s32.totalorder %s222_s9, %s222_s9  ;;  %p1521_p7 = scmp.lt.s32.totalorder %s1512_s15, %s1512_s15 }
  0x1a   : > { %p1503_p12 = pneg %p1843_p11 }
  0x1b   : > { %p1522_p9 = por %p1521_p7, %p1520_p5 }
  0x1c   : > { %p1515_p0 = pnand %p1513_p13, %p1503_p12 }
  0x1e   : > { %p1516_p3 = pneg %p1515_p0 }
  0x20   : > { %p1523_p10 = pnand %p1522_p9, %p1516_p3 }
  0x22   : > { %1526 = shalt.err (!%p1523_p10)
}
  0x23   : > { %s2116_s16 = smov 64   ;;  %s2117_s17 = smov 4  }
  0x24   : > { %s2129_s2 = sld [smem:[#allocation22_spill]]  ;;  %s1538_s20 = scalar_lea.vmem %s235_s12, 256 }
  0x25   : > { %p1539_p13 = scmp.ne.s32.totalorder %s235_s12, %s1538_s20  ;;  %p1546_p3 = scmp.lt.s32.totalorder %s235_s12, %s235_s12 }
  0x26   : > { %p1547_p10 = scmp.lt.s32.totalorder %s1538_s20, %s1538_s20 }
  0x27   : > { %p1541_p0 = pnand %p1539_p13, %p1503_p12 }
  0x28   : > { %p1548_p7 = por %p1547_p10, %p1546_p3 }
  0x29   : > { %p1542_p5 = pneg %p1541_p0 }
  0x2a   : > { %1383 = dma.hbm_to_vmem [thread:$0]  (!%p1843_p11), %s2129_s2, 256, %s222_s9, [#allocation8], %s2116_s16, %s2116_s16, %s2117_s17  }
  0x2b   : > { %p1549_p9 = pnand %p1548_p7, %p1542_p5 }
  0x2d   : > { %1552 = shalt.err (!%p1549_p9)
}
  0x2e   : > { %s2130_s3 = sld [smem:[#allocation23_spill]]  ;;  %s1564_s9 = scalar_lea.vmem %s248_s14, 256 }
  0x2f   : > { %p1565_p1 = scmp.ne.s32.totalorder %s248_s14, %s1564_s9  ;;  %p1572_p3 = scmp.lt.s32.totalorder %s248_s14, %s248_s14 }
  0x30   : > { %p1573_p5 = scmp.lt.s32.totalorder %s1564_s9, %s1564_s9 }
  0x31   : > { %p1567_p13 = pnand %p1565_p1, %p1503_p12 }
  0x32   : > { %p1574_p10 = por %p1573_p5, %p1572_p3 }
  0x33   : > { %p1568_p0 = pneg %p1567_p13 }
  0x34   : > { %1386 = dma.hbm_to_vmem [thread:$0]  (!%p1843_p11), %s2130_s3, 256, %s235_s12, [#allocation11], %s2116_s16, %s2116_s16, %s2117_s17  }
  0x35   : > { %p1575_p7 = pnand %p1574_p10, %p1568_p0 }
  0x37   : > { %1578 = shalt.err (!%p1575_p7)
}
  0x38   : > { %s2131_s4 = sld [smem:[#allocation24_spill]]  ;;  %s47_s12 = sadd.s32 1, %s1715_s23 }
  0x39   : > { %s38_s10 = sadd.s32 1, %s1723_s25  ;;  %p54_p1 = scmp.ne.s32.totalorder %s1715_s23, %s1711_s22 }
  0x3a   : > { %p40_p12 = scmp.ge.s32.totalorder %s38_s10, 2  ;;  %p55_p9 = scmp.eq.s32.totalorder %s1727_s26, 0 }
  0x3b   : > { %p1889_p13 = por %p196_p2, %p54_p1  ;;  %p1404_p0 = scmp.lt.s32.totalorder %s1727_s26, 2 }
  0x3c   : > { %s2149_s10 = smov (%p40_p12, %s38_s10), 0  ;;  %p56_p3 = por %p55_p9, %p54_p1 }
  0x3d   : > { %2133 = sst [smem:[#allocation20_spill]] %s2149_s10  ;;  %s1897_s18 = sand.u32 1, %s1715_s23  }
  0x3e   : > { %1389 = dma.hbm_to_vmem [thread:$0]  (!%p1843_p11), %s2131_s4, 256, %s248_s14, [#allocation11], %s2116_s16, %s2116_s16, %s2117_s17  }
  0x3f   : > { %s42_s14 = ssub.s32 %s1723_s25, %s2149_s10  ;;  %s1221_s19 = sshll.u32 %s1897_s18, 2 }
  0x40   : > { %p45_p11 = scmp.eq.s32.totalorder %s42_s14, 0  ;;  %s1222_s20 = sshll.u32 %s1723_s25, 6 }
  0x41   : > { %s2134_s0 = sld [smem:[#allocation21_spill]]  ;;  %s268_s13 = scalar_lea.vmem [#allocation4], %s1221_s19 }
  0x42   : > { %s1904_s28 = scalar_select %p45_p11, %s1715_s23, %s47_s12  }
  0x43   : > { %s276_s16 = sshll.u32 %s268_s13, 4  ;;  %p1911_p2 = pnand %p1404_p0, %p56_p3  ;;  %s277_s16 = int_to_ptr.vmem [resolvable:$true] %s276_s16 }
  0x44   : > { %s1223_s2 = sshll.u32 %s1897_s18, 3  ;;  %s1262_s14 = sshll.u32 %s1723_s25, 7 }
  0x45   : > { %s265_s3 = scalar_lea.sflag [#allocation5], %s1897_s18  ;;  %p1581_p5 = pneg %p1911_p2 }
  0x46   : > { %s1592_s12 = scalar_lea.vmem %s277_s16, 64  ;;  %s1734_s19 = smov [#allocation4]  }
  0x47   : > { %s274_s11 = scalar_lea.hbm %s2134_s0, %s1222_s20  ;;  %p1593_p10 = scmp.ne.s32.totalorder %s277_s16, %s1592_s12 }
  0x48   : > { %s1597_s20 = sshll.u32 %s1734_s19, 4  ;;  %s1598_s20 = int_to_ptr.vmem [resolvable:$false] %s1597_s20 }
  0x49   : > { %p1595_p7 = pnand %p1593_p10, %p1581_p5  ;;  %s1599_s8 = scalar_lea.vmem %s1598_s20, 128 }
  0x4a   : > { %p1600_p12 = scmp.lt.s32.totalorder %s277_s16, %s1598_s20  ;;  %p1601_p9 = scmp.lt.s32.totalorder %s1599_s8, %s1592_s12 }
  0x4b   : > { %p1596_p1 = pneg %p1595_p7 }
  0x4c   : > { %p1602_p0 = por %p1601_p9, %p1600_p12 }
  0x4e   : > { %p1603_p3 = pnand %p1602_p0, %p1596_p1 }
  0x50   : > { %1606 = shalt.err (!%p1603_p3)
}
  0x51   : > { %1393 = dma.hbm_to_vmem [thread:$0]  (!%p1911_p2), %s274_s11, 64, %s277_s16, %s265_s3  }
  0x52   : > { %s287_s18 = scalar_lea.vmem [#allocation7], %s1223_s2  ;;  %s283_s13 = sand.u32 1, %s1727_s26  }
  0x53   : > { %s294_s9 = sshll.u32 %s287_s18, 4  ;;  %s293_s19 = scalar_lea.hbm %s2109_s1, %s1262_s14  ;;  %s295_s9 = int_to_ptr.vmem [resolvable:$true] %s294_s9 }
  0x54   : > { %s284_s10 = scalar_lea.sflag [#allocation8], %s283_s13  ;;  %s1620_s25 = scalar_lea.vmem %s295_s9, 128 }
  0x55   : > { %p1621_p11 = scmp.ne.s32.totalorder %s295_s9, %s1620_s25  ;;  %s1735_s12 = smov [#allocation7]  }
  0x56   : > { %s1625_s20 = sshll.u32 %s1735_s12, 4  ;;  %s1626_s20 = int_to_ptr.vmem [resolvable:$false] %s1625_s20 }
  0x57   : > { %p1623_p10 = pnand %p1621_p11, %p1581_p5  ;;  %s1627_s8 = scalar_lea.vmem %s1626_s20, 256 }
  0x58   : > { %p1628_p1 = scmp.lt.s32.totalorder %s295_s9, %s1626_s20  ;;  %p1629_p12 = scmp.lt.s32.totalorder %s1627_s8, %s1620_s25 }
  0x59   : > { %p1624_p7 = pneg %p1623_p10 }
  0x5a   : > { %p1630_p9 = por %p1629_p12, %p1628_p1 }
  0x5c   : > { %p1631_p0 = pnand %p1630_p9, %p1624_p7 }
  0x5e   : > { %1634 = shalt.err (!%p1631_p0)
}
  0x5f   : > { %s2136_s0 = smov 4   ;;  %s2137_s2 = smov 64  }
  0x60   : > { %1396 = dma.hbm_to_vmem [thread:$0]  (!%p1911_p2), %s293_s19, 128, %s295_s9, %s284_s10, %s2137_s2, %s2137_s2, %s2136_s0  }
  0x61   : > { %306 = sbr.rel (%p1834_p8) target bundleno = 1511 (0x5e7), region = 44  ;;  %s1940_s3 = sand.u32 (!%p1834_p8), 1, %s1711_s22  }
  0x62   : > { %s1227_s4 = sshll.u32 (!%p1834_p8), %s1940_s3, 2  ;;  %s309_s25 = scalar_lea.sflag (!%p1834_p8), [#allocation5], %s1940_s3 }
  0x63   : > { %s1944_s16 = scalar_lea.vmem (!%p1834_p8), [#allocation4], %s1227_s4 }
  0x66   : > { %1686 = dma.done.wait (%p1824_p4), %s309_s25, 64  }
  0x67   : > { %1688 = vsyncadd (%p1824_p4), %s309_s25, 4294967232  ;;  %s317_s7 = sand.u32 1, %s1815_s27   ;;  %s1228_s17 = sshll.u32 %s1940_s3, 3 }
  0x68   : > { %s318_s10 = scalar_lea.sflag [#allocation8], %s317_s7  ;;  %s321_s11 = scalar_lea.vmem [#allocation7], %s1228_s17 }
  0x69   : > { %1690 = dma.done.wait (%p1824_p4), %s318_s10, 128  }
  0x6a   : > { %1692 = vsyncadd (%p1824_p4), %s318_s10, 4294967168  ;;  %p2138_p8 = scmp.eq.s32.totalorder %s1815_s27, 0 }
  0x6c   : > { %1694 = dma.done.wait (%p2138_p8), [#allocation8], 256   ;;  %p2139_p2 = pmov %p2138_p8 }
  0x6e   : > { %1696 = vsyncadd (%p2139_p2), [#allocation8], 4294967040  ;;  %p2140_p5 = pmov %p2139_p2 }
  0x6f   : > { %p2141_p3 = pmov %p2139_p2 }
  0x70   : > { %1698 = dma.done.wait (%p2140_p5), [#allocation11], 512  }
  0x71   : > { %1700 = vsyncadd (%p2141_p3), [#allocation11], 4294966784  ;;  %v1736_v0 = vmov 0.0   ;;  %vm1737_vm0 = vmmov 0   ;;  %v1474_v1 = vld [vmem:[#allocation10 + $0x8] sm:$0xff]   ;;  %v1475_v2 = vld [vmem:[#allocation10] sm:$0xff]  }
  0x72   : > { %1290 = vmatprep.subr.bf16.mxu0 %v1736_v0  ;;  %1294 = vmatprep.mubr.msk.bf16.mxu0 %vm1737_vm0, %v1736_v0  ;;  %v1477_v3 = vld [vmem:[#allocation9 + $0x8] sm:$0xff]   ;;  %v1476_v4 = vld [vmem:[%s321_s11] sm:$0xff]   ;;  %v1478_v5 = vld [vmem:[#allocation9] sm:$0xff]   ;;  %vm395_vm1 = vcmask 261120   ;;  %vm448_vm2 = vcmask 519168   ;;  %vm520_vm3 = vcmask 64512  }
  0x73   : > { %1298 = vmatprep.subr.bf16.mxu1 %v1736_v0  ;;  %1302 = vmatprep.mubr.msk.bf16.mxu1 %vm1737_vm0, %v1736_v0  ;;  %v451_v6 = vld [vmem:[%s1944_s16] sm:$0xf]  ;;  %s1738_s27 = smov 112   ;;  %s1739_s29 = smov 120   ;;  %vm567_vm4 = vcmask 130048   ;;  %vm628_vm5 = vcmask 60416  }
  0x74   : > { %1291 = vmatpush3.bf16.msra.mxu0 %v1474_v1  ;;  %1299 = vmatpush3.bf16.msra.mxu1 %v1477_v3  ;;  %s1740_s14 = smov 104   ;;  %s1741_s18 = smov 96   ;;  %vm752_vm6 = vcmask 126016   ;;  %vm875_vm7 = vcmask 191616   ;;  %vm998_vm8 = vcmask 257216  }
  0x75   : > { %1292 = vmatprep.subr.bf16.mxu0 %v1736_v0  ;;  %1300 = vmatprep.subr.bf16.mxu1 %v1736_v0  ;;  %s1742_s9 = smov 80   ;;  %s1743_s13 = smov 72  }
  0x76   : > { %s1744_s19 = smov 88   ;;  %s1745_s12 = smov 8  }
  0x77   : > { %s1746_s20 = smov 16   ;;  %s1747_s8 = smov 24  }
  0x78   : > { %1293 = vmatpush3.bf16.msra.mxu0 %v1475_v2  ;;  %1301 = vmatpush3.bf16.msra.mxu1 %v1478_v5  ;;  %s1259_s4 = sshll.u32 %s1719_s24, 7  ;;  %s366_s25 = scalar_lea.vmem [#allocation13], %s1228_s17 }
  0x79   : > { %1306 = vmatprep.subr.bf16.mxu0 %v1736_v0  ;;  %1312 = vmatprep.subr.bf16.mxu1 %v1736_v0  ;;  %s1083_s16 = sshll.u32 %s366_s25, 4  ;;  %s2059_s11 = scalar_lea.hbm %s2114_s6, %s1259_s4  ;;  %s2061_s16 = int_to_ptr.vmem [resolvable:$true] %s1083_s16 }
  0x7a   : > { %s1069_s24 = scalar_lea.sflag [#allocation6], %s1940_s3  ;;  %s1748_s17 = smov [#allocation13]  }
  0x7b   : > { %1295 = vmatmul.mubr.msk.bf16.vlgmr.msra.gmra.mxu0 %vm395_vm1, %v1476_v4  ;;  %1303 = vmatmul.mubr.msk.bf16.vlgmr.msra.gmra.mxu1 %vm395_vm1, %v451_v6 }
  0x7c   : > { %1308 = vmatprep.mubr.msk.bf16.mxu0 %vm1737_vm0, %v1736_v0  ;;  %1314 = vmatprep.mubr.msk.bf16.mxu1 %vm1737_vm0, %v1736_v0 }
 0x13b   : > { %v433_v7 = vpop.f32.mrf.mxu0  ;;  %v1983_v10 = vpop.f32.mrf.mxu1 }
 0x13c   : > { %v1263_v8 = vpack.c.bf16 %v433_v7, %v433_v7  ;;  %v514_v20 = vpack.c.bf16 %v1983_v10, %v1983_v10 }
 0x13d   : > { %v1296_v9 = vpop.f32.mrf.mxu0  ;;  %v1304_v13 = vpop.f32.mrf.mxu1 }
 0x13e   : > { %449 = vst.msk [vmem:[#allocation2] sm:$0xf] %vm448_vm2, %v1263_v8 }
 0x13f   : > { %v436_v11 = vpop.f32.mrf.mxu0  ;;  %v509_v15 = vpop.f32.mrf.mxu1 }
 0x140   : > { %v1264_v12 = vpack.c.bf16 %v436_v11, %v436_v11 }
 0x141   : > { %v1297_v14 = vpop.f32.mrf.mxu0  ;;  %v1305_v16 = vpop.f32.mrf.mxu1 }
 0x142   : > { %450 = vst.msk [vmem:[#allocation2 + $0x4] sm:$0xf] %vm448_vm2, %v1264_v12 }
 0x149   : > { %v1985_v17 = vld [vmem:[#allocation2] sm:$0xff]  }
 0x14a   : > { %v1987_v18 = vld [vmem:[#allocation2] sm:$0xff]   ;;  %763 = vrot.lane.b32.xlu1 %v1985_v17, %s1738_s27 }
 0x14b   : > { %v1989_v19 = vld [vmem:[#allocation2] sm:$0xff]   ;;  %640 = vrot.lane.b32.xlu0 %v1987_v18, %s1739_s29 }
 0x14c   : > { %v525_v21 = vsel %vm520_vm3, %v1989_v19, 0  ;;  %v1998_v22 = vld [vmem:[#allocation2] sm:$0xff]  }
 0x14d   : > { %1307 = vmatpush3.bf16.xpose.msra.mxu0 %v525_v21 }
 0x14e   : > { %1318 = vmatprep.subr.bf16.mxu0 %v1736_v0  ;;  %756 = vrot.lane.b32.xlu1 %v514_v20, %s1738_s27  ;;  %s1635_s27 = scalar_lea.vmem %s2061_s16, 128 }
 0x14f   : > { %633 = vrot.lane.b32.xlu0 %v514_v20, %s1739_s29  ;;  %p1636_p4 = scmp.ne.s32.totalorder %s2061_s16, %s1635_s27  ;;  %s1639_s29 = sshll.u32 %s1748_s17, 4  ;;  %s1640_s29 = int_to_ptr.vmem [resolvable:$false] %s1639_s29 }
 0x150   : > { %p1642_p7 = scmp.lt.s32.totalorder %s2061_s16, %s1640_s29 }
 0x151   : > { %p1637_p11 = pnand %p1636_p4, %p1889_p13 }
 0x152   : > { %879 = vrot.lane.b32.xlu1 %v514_v20, %s1740_s14 }
 0x153   : > { %886 = vrot.lane.b32.xlu0 %v1998_v22, %s1740_s14  ;;  %p1638_p10 = pneg %p1637_p11  ;;  %s1641_s14 = scalar_lea.vmem %s1640_s29, 256 }
 0x154   : > { %1309 = vmatmul.mubr.msk.bf16.vlgmr.msra.gmra.mxu0 %vm520_vm3, %v514_v20  ;;  %p1643_p1 = scmp.lt.s32.totalorder %s1641_s14, %s1635_s27 }
 0x155   : > { %1320 = vmatprep.mubr.msk.bf16.mxu0 %vm1737_vm0, %v1736_v0 }
 0x156   : > { %p1644_p12 = por %p1643_p1, %p1642_p7 }
 0x158   : > { %p1645_p9 = pnand %p1644_p12, %p1638_p10 }
 0x1bc   : > { %v764_v25 = vpop.permute.xlu1 %763 }
 0x1bd   : > { %v641_v23 = vpop.permute.xlu0 %640  ;;  %v769_v27 = vsel %vm520_vm3, %v764_v25, 0 }
 0x1be   : > { %v646_v24 = vsel %vm520_vm3, %v641_v23, 0 }
 0x1bf   : > { %1319 = vmatpush3.bf16.xpose.msra.mxu0 %v646_v24 }
 0x1c0   : > { %1330 = vmatprep.subr.bf16.mxu0 %v1736_v0  ;;  %v757_v29 = vpop.permute.xlu1 %756 }
 0x1c1   : > { %v634_v26 = vpop.permute.xlu0 %633 }
 0x1c4   : > { %v880_v31 = vpop.permute.xlu1 %879 }
 0x1c5   : > { %v887_v28 = vpop.permute.xlu0 %886 }
 0x1c6   : > { %1321 = vmatmul.mubr.msk.bf16.vlgmr.msra.gmra.mxu0 %vm520_vm3, %v634_v26  ;;  %v892_v30 = vsel %vm520_vm3, %v887_v28, 0 }
 0x1c7   : > { %1331 = vmatpush3.bf16.xpose.msra.mxu0 %v769_v27  ;;  %1332 = vmatprep.mubr.msk.bf16.mxu0 %vm1737_vm0, %v1736_v0 }
 0x1c8   : > { %1342 = vmatprep.subr.bf16.mxu0 %v1736_v0 }
 0x1ce   : > { %1333 = vmatmul.mubr.msk.bf16.vlgmr.msra.gmra.mxu0 %vm520_vm3, %v757_v29 }
 0x1cf   : > { %1343 = vmatpush3.bf16.xpose.msra.mxu0 %v892_v30  ;;  %1344 = vmatprep.mubr.msk.bf16.mxu0 %vm1737_vm0, %v1736_v0 }
 0x1d0   : > { %1354 = vmatprep.subr.bf16.mxu0 %v1736_v0 }
 0x1d6   : > { %1345 = vmatmul.mubr.msk.bf16.vlgmr.msra.gmra.mxu0 %vm520_vm3, %v880_v31 }
 0x1d7   : > { %1358 = vmatprep.mubr.msk.bf16.mxu0 %vm1737_vm0, %v1736_v0 }
 0x214   : > { %v561_v32 = vpop.f32.mrf.mxu0 }
 0x215   : > { %v568_v33 = vsel %vm567_vm4, %v561_v32, -inf }
 0x216   : > { %569 = vmax.xlane.f32.xlu0 %v568_v33  ;;  %v1310_v34 = vpop.f32.mrf.mxu0 }
 0x218   : > { %v564_v35 = vpop.f32.mrf.mxu0 }
 0x21a   : > { %v1311_v36 = vpop.f32.mrf.mxu0 }
 0x286   : > { %v682_v37 = vpop.f32.mrf.mxu0 }
 0x287   : > { %v688_v38 = vsel %vm567_vm4, %v682_v37, -inf }
 0x288   : > { %689 = vmax.xlane.f32.xlu1 %v688_v38  ;;  %v1322_v39 = vpop.f32.mrf.mxu0 }
 0x28a   : > { %v685_v40 = vpop.f32.mrf.mxu0 }
 0x28c   : > { %v1323_v41 = vpop.f32.mrf.mxu0 }
 0x28d   : > { %v1483_v41 = vld [vmem:[#allocation12 + $0x8] sm:$0xff]  }
 0x28e   : > { %v805_v42 = vpop.f32.mrf.mxu0  ;;  %1355 = vmatpush3.bf16.msra.mxu0 %v1483_v41 }
 0x28f   : > { %v811_v43 = vsel %vm567_vm4, %v805_v42, -inf  ;;  %1356 = vmatprep.subr.bf16.mxu0 %v1736_v0 }
 0x290   : > { %812 = vmax.xlane.f32.xlu0 %v811_v43  ;;  %v1334_v44 = vpop.f32.mrf.mxu0  ;;  %v1484_v43 = vld [vmem:[#allocation12] sm:$0xff]  }
 0x292   : > { %v808_v45 = vpop.f32.mrf.mxu0  ;;  %1357 = vmatpush3.bf16.msra.mxu0 %v1484_v43 }
 0x294   : > { %v1335_v46 = vpop.f32.mrf.mxu0 }
 0x296   : > { %v928_v47 = vpop.f32.mrf.mxu0 }
 0x297   : > { %v934_v48 = vsel %vm567_vm4, %v928_v47, -inf }
 0x298   : > { %935 = vmax.xlane.f32.xlu0 %v934_v48  ;;  %v1346_v49 = vpop.f32.mrf.mxu0 }
 0x29a   : > { %v931_v50 = vpop.f32.mrf.mxu0 }
 0x29c   : > { %v1347_v51 = vpop.f32.mrf.mxu0 }
 0x29f   : > { %v570_v52 = vpop.xlane.xlu0 %569 }
 0x2a0   : > { %v571_v53 = vsub.f32 %v561_v32, %v570_v52 }
 0x2a2   : > { %v572_v54 = vmul.f32 1.442695, %v571_v53 }
 0x2a4   : > { %1485 = vpow2.f32 %v572_v54 }
 0x2b1   : > { %v1486_v55 = vpop.eup %1485 }
 0x2b2   : > { %v574_v56 = vsel %vm567_vm4, %v1486_v55, 0.0 }
 0x2b3   : > { %575 = vadd.xlane.f32.xlu1 %v574_v56 }
 0x2c4   : > { %580 = vrot.lane.b32.xlu1 %v1989_v19, %s1741_s18 }
 0x311   : > { %v690_v57 = vpop.xlane.xlu1 %689 }
 0x312   : > { %v691_v58 = vsub.f32 %v682_v37, %v690_v57 }
 0x314   : > { %v692_v59 = vmul.f32 1.442695, %v691_v58 }
 0x316   : > { %1487 = vpow2.f32 %v692_v59  ;;  %v1254_v59 = vld [vmem:[%s2113_s5] ss:$0 sm:$0xff] }
 0x319   : > { %v813_v60 = vpop.xlane.xlu0 %812 }
 0x31a   : > { %v814_v61 = vsub.f32 %v805_v42, %v813_v60 }
 0x31c   : > { %v815_v62 = vmul.f32 1.442695, %v814_v61 }
 0x31e   : > { %1489 = vpow2.f32 %v815_v62 }
 0x321   : > { %v936_v63 = vpop.xlane.xlu0 %935 }
 0x322   : > { %v937_v1 = vsub.f32 %v928_v47, %v936_v63 }
 0x323   : > { %v1488_v2 = vpop.eup %1487 }
 0x324   : > { %v938_v3 = vmul.f32 1.442695, %v937_v1  ;;  %v694_v4 = vsel %vm567_vm4, %v1488_v2, 0.0 }
 0x325   : > { %695 = vadd.xlane.f32.xlu0 %v694_v4 }
 0x326   : > { %1491 = vpow2.f32 %v938_v3 }
 0x32b   : > { %v1490_v5 = vpop.eup %1489 }
 0x32c   : > { %v817_v6 = vsel %vm567_vm4, %v1490_v5, 0.0 }
 0x32d   : > { %818 = vadd.xlane.f32.xlu1 %v817_v6 }
 0x333   : > { %v1492_v7 = vpop.eup %1491 }
 0x334   : > { %v940_v8 = vsel %vm567_vm4, %v1492_v7, 0.0 }
 0x335   : > { %941 = vadd.xlane.f32.xlu0 %v940_v8 }
 0x33c   : > { %v576_v9 = vpop.xlane.xlu1 %575 }
 0x33d   : > { %1493 = vrcp.f32 %v576_v9 }
 0x33e   : > { %823 = vrot.lane.b32.xlu1 %v1985_v17, %s1742_s9 }
 0x340   : > { %v581_v11 = vpop.permute.xlu1 %580 }
 0x341   : > { %1313 = vmatpush3.bf16.msra.mxu1 %v581_v11 }
 0x342   : > { %1324 = vmatprep.subr.bf16.mxu1 %v1736_v0  ;;  %946 = vrot.lane.b32.xlu1 %v1998_v22, %s1743_s13 }
 0x34a   : > { %v1494_v12 = vpop.eup %1493 }
 0x34b   : > { %v578_v13 = vmul.f32 %v1494_v12, %v1486_v55  ;;  %700 = vrot.lane.b32.xlu0 %v1987_v18, %s1744_s19 }
 0x34d   : > { %v579_v14 = vpack.c.bf16 %v578_v13, %v578_v13 }
 0x34f   : > { %1315 = vmatmul.mubr.msk.bf16.vlgmr.msra.gmra.mxu1 %vm567_vm4, %v579_v14 }
 0x350   : > { %1326 = vmatprep.mubr.msk.bf16.mxu1 %vm1737_vm0, %v1736_v0 }
 0x3ae   : > { %v696_v15 = vpop.xlane.xlu0 %695 }
 0x3af   : > { %1495 = vrcp.f32 %v696_v15 }
 0x3b6   : > { %v819_v16 = vpop.xlane.xlu1 %818 }
 0x3b7   : > { %1497 = vrcp.f32 %v819_v16 }
 0x3ba   : > { %v824_v23 = vpop.permute.xlu1 %823 }
 0x3bc   : > { %v1496_v17 = vpop.eup %1495 }
 0x3bd   : > { %v698_v20 = vmul.f32 %v1496_v17, %v1488_v2 }
 0x3be   : > { %v942_v19 = vpop.xlane.xlu0 %941  ;;  %v947_v27 = vpop.permute.xlu1 %946 }
 0x3bf   : > { %1499 = vrcp.f32 %v942_v19  ;;  %v699_v22 = vpack.c.bf16 %v698_v20, %v698_v20 }
 0x3c2   : > { %v701_v21 = vpop.permute.xlu0 %700 }
 0x3c3   : > { %1325 = vmatpush3.bf16.msra.mxu1 %v701_v21 }
 0x3c4   : > { %1336 = vmatprep.subr.bf16.mxu1 %v1736_v0  ;;  %v1498_v18 = vpop.eup %1497 }
 0x3c5   : > { %v821_v24 = vmul.f32 %v1498_v18, %v1490_v5 }
 0x3c6   : > { %1327 = vmatmul.mubr.msk.bf16.vlgmr.msra.gmra.mxu1 %vm567_vm4, %v699_v22 }
 0x3c7   : > { %1337 = vmatpush3.bf16.msra.mxu1 %v824_v23  ;;  %1338 = vmatprep.mubr.msk.bf16.mxu1 %vm1737_vm0, %v1736_v0  ;;  %v822_v25 = vpack.c.bf16 %v821_v24, %v821_v24 }
 0x3c8   : > { %1348 = vmatprep.subr.bf16.mxu1 %v1736_v0 }
 0x3cc   : > { %v1500_v26 = vpop.eup %1499 }
 0x3cd   : > { %v944_v28 = vmul.f32 %v1500_v26, %v1492_v7 }
 0x3ce   : > { %1339 = vmatmul.mubr.msk.bf16.vlgmr.msra.gmra.mxu1 %vm567_vm4, %v822_v25 }
 0x3cf   : > { %1349 = vmatpush3.bf16.msra.mxu1 %v947_v27  ;;  %1350 = vmatprep.mubr.msk.bf16.mxu1 %vm1737_vm0, %v1736_v0  ;;  %v945_v29 = vpack.c.bf16 %v944_v28, %v944_v28 }
 0x3d6   : > { %1351 = vmatmul.mubr.msk.bf16.vlgmr.msra.gmra.mxu1 %vm567_vm4, %v945_v29 }
 0x40f   : > { %v620_v30 = vpop.f32.mrf.mxu1 }
 0x410   : > { %v626_v31 = vadd.f32 %v620_v30, %v1983_v10 }
 0x411   : > { %v1316_v32 = vpop.f32.mrf.mxu1 }
 0x412   : > { %v627_v33 = vpack.c.bf16 %v626_v31, %v626_v31 }
 0x413   : > { %v623_v34 = vpop.f32.mrf.mxu1 }
 0x414   : > { %629 = vst.msk [vmem:[#allocation3] sm:$0xf] %vm628_vm5, %v627_v33 }
 0x415   : > { %v1317_v35 = vpop.f32.mrf.mxu1 }
 0x486   : > { %v740_v36 = vpop.f32.mrf.mxu1 }
 0x487   : > { %747 = vrot.lane.b32.xlu0 %v740_v36, %s1745_s12 }
 0x488   : > { %v1328_v37 = vpop.f32.mrf.mxu1 }
 0x48a   : > { %v743_v38 = vpop.f32.mrf.mxu1 }
 0x48c   : > { %v1329_v39 = vpop.f32.mrf.mxu1 }
 0x48e   : > { %v863_v40 = vpop.f32.mrf.mxu1 }
 0x48f   : > { %870 = vrot.lane.b32.xlu1 %v863_v40, %s1746_s20 }
 0x490   : > { %v1340_v42 = vpop.f32.mrf.mxu1 }
 0x492   : > { %v866_v44 = vpop.f32.mrf.mxu1 }
 0x494   : > { %v1341_v45 = vpop.f32.mrf.mxu1 }
 0x496   : > { %v986_v46 = vpop.f32.mrf.mxu1 }
 0x497   : > { %993 = vrot.lane.b32.xlu0 %v986_v46, %s1747_s8 }
 0x498   : > { %v1352_v47 = vpop.f32.mrf.mxu1 }
 0x49a   : > { %v989_v48 = vpop.f32.mrf.mxu1 }
 0x49c   : > { %v1353_v49 = vpop.f32.mrf.mxu1 }
 0x4f9   : > { %v748_v50 = vpop.permute.xlu0 %747 }
 0x4fa   : > { %v750_v51 = vadd.f32 %v748_v50, %v1983_v10 }
 0x4fc   : > { %v751_v52 = vpack.c.bf16 %v750_v51, %v750_v51 }
 0x4fe   : > { %753 = vst.msk [vmem:[#allocation3] sm:$0xf] %vm752_vm6, %v751_v52 }
 0x501   : > { %v871_v53 = vpop.permute.xlu1 %870 }
 0x502   : > { %v873_v0 = vadd.f32 %v871_v53, %v1983_v10 }
 0x504   : > { %v874_v54 = vpack.c.bf16 %v873_v0, %v873_v0 }
 0x506   : > { %876 = vst.msk [vmem:[#allocation3] sm:$0xf] %vm875_vm7, %v874_v54 }
 0x509   : > { %v994_v55 = vpop.permute.xlu0 %993 }
 0x50a   : > { %v996_v56 = vadd.f32 %v994_v55, %v1983_v10 }
 0x50c   : > { %v997_v57 = vpack.c.bf16 %v996_v56, %v996_v56 }
 0x50e   : > { %999 = vst.msk [vmem:[#allocation3] sm:$0xf] %vm998_vm8, %v997_v57 }
 0x515   : > { %v1000_v58 = vld [vmem:[#allocation3] sm:$0xf] }
 0x516   : > { %1359 = vmatmul.mubr.msk.bf16.vlgmr.msra.gmra.mxu0 %vm395_vm1, %v1000_v58 }
 0x5d6   : > { %v1061_v60 = vpop.f32.mrf.mxu0 }
 0x5d7   : > { %v1062_v61 = vadd.f32 %v1254_v59, %v1061_v60 }
 0x5d8   : > { %v1360_v10 = vpop.f32.mrf.mxu0 }
 0x5d9   : > { %1067 = vst.msk [vmem:[%s366_s25] sm:$0xff] %vm395_vm1, %v1062_v61 }
 0x5da   : > { %v1064_v62 = vpop.f32.mrf.mxu0 }
 0x5db   : > { %1648 = shalt.err (!%p1645_p9)
}
 0x5dc   : > { %s1649_s18 = scalar_lea.hbm %s2059_s11, 128  ;;  %s1653_s13 = scalar_lea.hbm %s2114_s6, 256 }
 0x5dd   : > { %p1650_p0 = scmp.ne.s32.totalorder %s2059_s11, %s1649_s18  ;;  %p1654_p5 = scmp.lt.s32.totalorder %s2059_s11, %s2114_s6 }
 0x5de   : > { %p1655_p3 = scmp.lt.s32.totalorder %s1653_s13, %s1649_s18 }
 0x5df   : > { %p1651_p8 = pnand %p1650_p0, %p1889_p13 }
 0x5e0   : > { %p1656_p4 = por %p1655_p3, %p1654_p5 }
 0x5e1   : > { %p1652_p2 = pneg %p1651_p8 }
 0x5e3   : > { %p1657_p11 = pnand %p1656_p4, %p1652_p2 }
 0x5e5   : > { %1660 = shalt.err (!%p1657_p11)
}
 0x5e6   : > { %1378 = dma.vmem_to_hbm [thread:$0]  (%p1889_p13), %s2061_s16, 128, %s2059_s11, %s1069_s24   ;;  %v1361_v63 = vpop.f32.mrf.mxu0 }
 0x5e7 PF: > { %s1095_s20 = sand.u32 1, %s1707_s21   ;;  %p2142_p10 = scmp.ge.s32.totalorder %s1727_s26, 2 }
 0x5e8   : > { %s1096_s8 = scalar_lea.sflag [#allocation6], %s1095_s20 }
 0x5e9   : > { %p1398_p7 = pnand %p2142_p10, %p1829_p6 }
 0x5eb   : > { %p1399_p1 = pneg %p1398_p7 }
 0x5ed   : > { %1702 = dma.done.wait (%p1399_p1), %s1096_s8, 128  }
 0x5ee   : > { %1704 = vsyncadd (%p1399_p1), %s1096_s8, 4294967168  ;;  %s26_s26 = sadd.s32 1, %s1727_s26   ;;  %s2143_s24 = sld [smem:[#allocation19_spill]] }
 0x5ef   : > { %p23_p12 = scmp.ge.s32.totalorder %s26_s26, 4   ;;  %s2144_s25 = sld [smem:[#allocation20_spill]] }
 0x5f0   : > { %s2145_s21 = smov %s1711_s22  ;;  %s2146_s22 = smov %s1715_s23 }
 0x5f1   : > { %s2147_s23 = smov %s1904_s28  ;;  %25 = sbr.rel (!%p23_p12) target bundleno = 14 (0xe), region = 118 }
 0x5f6   :  { %1101 = vsyncpa [#allocation5], 1 }
 0x5f7   :  { %1103 = vsyncpa [#allocation5 + $0x1], 1 }
 0x5f8   :  { %1104 = vsyncpa [#allocation8], 1 }
 0x5f9   :  { %1106 = vsyncpa [#allocation8 + $0x1], 1 }
 0x5fa   :  { %1107 = vsyncpa [#allocation11], 1 }
 0x5fb   :  { %1108 = vsyncpa [#allocation6], 1 }
 0x5fc   :  { %1110 = vsyncpa [#allocation6 + $0x1], 1 }

</bundles_post_ra>
